<compile_context>
chip_gen: v5e
topology: v5e:2x2
jax: 0.10.0
libtpu: 0.0.40
codegen_flags: <defaults>
</compile_context>

<pallas_src>
import functools

import jax
import jax.numpy as jnp
import numpy as np
from jax.experimental import pallas as pl
from jax.experimental.pallas import tpu as pltpu


def _stage_pool_matrix(out_len, in_len):
    """M[i, k] = 1 iff k in {2i-1, 2i, 2i+1} and 0 <= k < in_len (numpy, exact)."""
    o = np.arange(out_len)[:, None]
    k = np.arange(in_len)[None, :]
    return (np.abs(k - 2 * o) <= 1).astype(np.float32)


def _composed_pool_matrices(H, W, r):
    """Compose r AvgPool2d(3,2,1) stages: PV (Hr, H), PHt (W, Wr) -- host-side."""
    pv = np.eye(H, dtype=np.float32)
    pht = np.eye(W, dtype=np.float32)
    h, w = H, W
    for _ in range(r):
        ho, wo = (h + 1) // 2, (w + 1) // 2
        pv = _stage_pool_matrix(ho, h) @ pv        # (ho, H) small integer counts
        pht = pht @ _stage_pool_matrix(wo, w).T    # (W, wo) small integer counts
        h, w = ho, wo
    return pv, pht, h, w


def _fused_pool_kernel(x_ref, pv_ref, pht_ref, o_ref, *, scale):
    """x_ref: (nb, H, W); pv_ref: (Ho, H); pht_ref: (W, Wo); o_ref: (nb, Ho, Wo)."""
    nb, H, W = x_ref.shape
    Ho = pv_ref.shape[0]
    Wo = pht_ref.shape[1]

    x = x_ref[...]
    pv = pv_ref[...]      # resident across grid steps (constant index_map)
    pht = pht_ref[...]    # resident across grid steps (constant index_map)

    # --- W-contraction: fold planes into the matmul M dimension (MXU fill). ---
    if H % 8 == 0:
        t = jnp.dot(x.reshape(nb * H, W), pht,
                    preferred_element_type=jnp.float32)             # (nb*H, Wo)
        t = t.reshape(nb, H, Wo)
    else:
        # Sublane-unfriendly H: fall back to a canonical batched matmul.
        pht_b = jnp.broadcast_to(pht, (nb, W, Wo))
        t = jnp.einsum('nhw,nwv->nhv', x, pht_b,
                       preferred_element_type=jnp.float32)          # (nb, H, Wo)

    # --- H-contraction: one batched matmul, one dense store of the block. ---
    pv_b = jnp.broadcast_to(pv, (nb, Ho, H))
    y = jnp.einsum('noh,nhv->nov', pv_b, t,
                   preferred_element_type=jnp.float32)              # (nb, Ho, Wo)

    if scale is not None:  # only for non-f32 inputs; f32 folds scale into PHt
        y = y * jnp.float32(scale)
    o_ref[...] = y.astype(o_ref.dtype)


def _choose_nb(P, plane_bytes, budget_bytes=6 << 20):
    """Planes per grid step: VMEM-budgeted, divisor-preferring, >=2 grid steps."""
    cap = max(1, min(P, int(budget_bytes // max(plane_bytes, 1))))
    if P >= 2:
        cap = min(cap, pl.cdiv(P, 2))   # keep >= 2 grid steps (v7x: 2 TensorCores)
    best_div = max(d for d in range(1, cap + 1) if P % d == 0)
    if 2 * best_div >= cap:             # a divisor close to the budget cap: no padding
        return best_div, 0
    pad = (-P) % cap                    # pad planes instead of collapsing to nb=1
    return cap, pad


def input_injection_forward(x, downsampling_ratio):
    """x: (B, C, H, W).  Applies `downsampling_ratio` AvgPool2d(3, 2, 1) layers."""
    B, C, H, W = x.shape
    if downsampling_ratio == 0:
        return x

    pv_np, pht_np, Ho, Wo = _composed_pool_matrices(H, W, downsampling_ratio)
    scale = (1.0 / 9.0) ** downsampling_ratio

    mat_dtype = x.dtype if jnp.issubdtype(x.dtype, jnp.floating) else jnp.float32
    if mat_dtype == jnp.float32:
        pht_np = pht_np * np.float32(scale)   # fold scale host-side (no VPU pass)
        kernel_scale = None
    else:
        kernel_scale = scale                  # keep matrices integer-exact (bf16 lossless)
    pv = jnp.asarray(pv_np, dtype=mat_dtype)
    pht = jnp.asarray(pht_np, dtype=mat_dtype)

    P = B * C
    isz = jnp.dtype(x.dtype).itemsize
    nb, pad = _choose_nb(P, H * W * isz)

    y = x.reshape(P, H, W)
    if pad:
        y = jnp.pad(y, ((0, pad), (0, 0), (0, 0)))
    Pp = P + pad
    grid = (Pp // nb,)

    mat_isz = jnp.dtype(mat_dtype).itemsize
    # Working-set estimate: double-buffered in/out/matrices + f32 intermediates.
    vmem_need = (2 * (nb * H * W * isz + nb * Ho * Wo * isz
                      + (Ho * H + W * Wo) * mat_isz)
                 + 4 * nb * (H * Wo + Ho * H + Ho * Wo))
    vmem_limit = int(min(max(2 * vmem_need, 32 << 20), 56 << 20))

    cost = pl.CostEstimate(
        flops=int(2 * Pp * (H * W * Wo + Ho * H * Wo)),
        transcendentals=0,
        bytes_accessed=int(Pp * (H * W + Ho * Wo) * isz
                           + (Ho * H + W * Wo) * mat_isz),
    )

    out = pl.pallas_call(
        functools.partial(_fused_pool_kernel, scale=kernel_scale),
        out_shape=jax.ShapeDtypeStruct((Pp, Ho, Wo), x.dtype),
        grid_spec=pltpu.PrefetchScalarGridSpec(
            num_scalar_prefetch=0,
            grid=grid,
            in_specs=[
                pl.BlockSpec((nb, H, W), lambda p: (p, 0, 0)),   # planes (pipelined)
                pl.BlockSpec((Ho, H), lambda p: (0, 0)),         # PV  (resident)
                pl.BlockSpec((W, Wo), lambda p: (0, 0)),         # PHt (resident)
            ],
            out_specs=pl.BlockSpec((nb, Ho, Wo), lambda p: (p, 0, 0)),
        ),
        compiler_params=pltpu.CompilerParams(
            dimension_semantics=("parallel",),
            vmem_limit_bytes=vmem_limit,
        ),
        cost_estimate=cost,
    )(y, pv, pht)

    if pad:
        out = out[:P]
    return out.reshape(B, C, Ho, Wo)


def _reference(x, downsampling_ratio):
    """Pure-JAX reference for chained AvgPool2d(3, 2, 1, count_include_pad=True)."""
    y = x
    for _ in range(downsampling_ratio):
        B, C, H, W = y.shape
        Ho, Wo = (H + 1) // 2, (W + 1) // 2
        yp = jnp.pad(y, ((0, 0), (0, 0), (1, 1), (1, 1)))
        s = jnp.zeros((B, C, Ho, Wo), y.dtype)
        for di in range(3):
            for dj in range(3):
                s = s + yp[:, :, di:di + 2 * Ho:2, dj:dj + 2 * Wo:2]
        y = s * (1.0 / 9.0)
    return y


if __name__ == "__main__":
    B, C, H, W = 2, 4, 16, 16
    downsampling_ratio = 2

    key = jax.random.PRNGKey(0)
    x = jax.random.normal(key, (B, C, H, W), dtype=jnp.float32)

    out = jax.block_until_ready(input_injection_forward(x, downsampling_ratio))
    ref = jax.block_until_ready(_reference(x, downsampling_ratio))

    assert out.shape == ref.shape == (B, C, 4, 4), out.shape
    assert jnp.max(jnp.abs(out - ref)) < 1e-5

    print("KERNEL_OK")
</pallas_src>

<mosaic_0001>
module attributes {stable_mosaic.version = 11 : i64} {
  func.func @_fused_pool_kernel(%arg0: i32, %arg1: memref<4x16x16xf32, #tpu.memory_space<vmem>>, %arg2: memref<4x16xf32, #tpu.memory_space<vmem>>, %arg3: memref<16x4xf32, #tpu.memory_space<vmem>>, %arg4: memref<4x4x4xf32, #tpu.memory_space<vmem>>) attributes {dimension_semantics = [#tpu.dimension_semantics<parallel>], iteration_bounds = array<i64: 2>, scalar_prefetch = 0 : i64, scratch_operands = 0 : i64, tpu.core_type = #tpu.core_type<tc>, window_params = [{transform_indices = @transform_0, window_bounds = array<i64: 4, 16, 16>}, {pipeline_mode = #tpu.pipeline_mode<synchronous>, transform_indices = @transform_1, window_bounds = array<i64: 4, 16>}, {pipeline_mode = #tpu.pipeline_mode<synchronous>, transform_indices = @transform_2, window_bounds = array<i64: 16, 4>}, {transform_indices = @transform_3, window_bounds = array<i64: 4, 4, 4>}]} {
    %c0 = arith.constant 0 : index
    %c0_0 = arith.constant 0 : index
    %c0_1 = arith.constant 0 : index
    %0 = vector.load %arg1[%c0, %c0_0, %c0_1] : memref<4x16x16xf32, #tpu.memory_space<vmem>>, vector<4x16x16xf32>
    %c0_2 = arith.constant 0 : index
    %c0_3 = arith.constant 0 : index
    %1 = vector.load %arg2[%c0_2, %c0_3] : memref<4x16xf32, #tpu.memory_space<vmem>>, vector<4x16xf32>
    %c0_4 = arith.constant 0 : index
    %c0_5 = arith.constant 0 : index
    %2 = vector.load %arg3[%c0_4, %c0_5] : memref<16x4xf32, #tpu.memory_space<vmem>>, vector<16x4xf32>
    %3 = vector.shape_cast %0 : vector<4x16x16xf32> to vector<64x16xf32>
    %cst = arith.constant dense<0.000000e+00> : vector<64x4xf32>
    %4 = tpu.matmul %3, %2, %cst {dimension_numbers = #tpu.dot_dimension_numbers<[1], [0], [0], [1], [0, 0, 1, 1], [], []>} : vector<64x16xf32>, vector<16x4xf32>, vector<64x4xf32> -> vector<64x4xf32>
    %5 = vector.shape_cast %4 : vector<64x4xf32> to vector<4x16x4xf32>
    %6 = vector.shape_cast %1 : vector<4x16xf32> to vector<1x4x16xf32>
    %7 = vector.broadcast %6 : vector<1x4x16xf32> to vector<4x4x16xf32>
    "tpu.trace_start"() <{level = 10 : i32, message = "noh,nhv->nov"}> : () -> ()
    %cst_6 = arith.constant dense<0.000000e+00> : vector<4x4x4xf32>
    %8 = tpu.matmul %7, %5, %cst_6 {dimension_numbers = #tpu.dot_dimension_numbers<[2], [1], [1], [2], [0, 0, 0, 1, 1, 2], [0], [0]>} : vector<4x4x16xf32>, vector<4x16x4xf32>, vector<4x4x4xf32> -> vector<4x4x4xf32>
    "tpu.trace_stop"() : () -> ()
    %c0_7 = arith.constant 0 : index
    %c0_8 = arith.constant 0 : index
    %c0_9 = arith.constant 0 : index
    %9 = vector.load %arg4[%c0_7, %c0_8, %c0_9] : memref<4x4x4xf32, #tpu.memory_space<vmem>>, vector<4x4x4xf32>
    tpu.vector_store %arg4[%c0_7, %c0_8, %c0_9], %8 {strides = array<i32>} : memref<4x4x4xf32, #tpu.memory_space<vmem>>, vector<4x4x4xf32>,
    return
  }
  func.func @transform_0(%arg0: i32) -> (i32, i32, i32) {
    %c0_i32 = arith.constant 0 : i32
    %c0_i32_0 = arith.constant 0 : i32
    %c0_i32_1 = arith.constant 0 : i32
    return %arg0, %c0_i32, %c0_i32_0 : i32, i32, i32
  }
  func.func @transform_1(%arg0: i32) -> (i32, i32) {
    %c0_i32 = arith.constant 0 : i32
    %c0_i32_0 = arith.constant 0 : i32
    %c0_i32_1 = arith.constant 0 : i32
    return %c0_i32, %c0_i32_0 : i32, i32
  }
  func.func @transform_2(%arg0: i32) -> (i32, i32) {
    %c0_i32 = arith.constant 0 : i32
    %c0_i32_0 = arith.constant 0 : i32
    %c0_i32_1 = arith.constant 0 : i32
    return %c0_i32, %c0_i32_0 : i32, i32
  }
  func.func @transform_3(%arg0: i32) -> (i32, i32, i32) {
    %c0_i32 = arith.constant 0 : i32
    %c0_i32_0 = arith.constant 0 : i32
    %c0_i32_1 = arith.constant 0 : i32
    return %arg0, %c0_i32, %c0_i32_0 : i32, i32, i32
  }
}

</mosaic_0001>

<bundles_post_ra>
// kernel: tpu_custom_call.1
= control target key start
LH: loop header
LB: loop body
LE: loop exit
PB: predicated region body
PF: predicated region fallthrough
CT: control target
= control target key end

     0   :  { %8 = vsyncpa [#allocation3], 0  ;;  %s703_s0 = inlined_call_operand.hbm [shape: f32[8,16,16], index: 0, kind: input, shape index: {}]   ;;  %s704_s1 = inlined_call_operand.vmem [shape: f32[4,16], index: 1, kind: input, shape index: {}]   ;;  %s705_s2 = inlined_call_operand.vmem [shape: f32[16,4], index: 2, kind: input, shape index: {}]   ;;  %s706_s3 = inlined_call_operand.vmem [shape: f32[8,4,4], index: 3, kind: output, shape index: {}]  }
   0x1   :  { %10 = vsyncpa [#allocation3 + $0x1], 0  ;;  %s591_s12 = smov 0   ;;  %s593_s13 = smov 0  }
   0x2   :  { %s595_s14 = smov 0   ;;  %s597_s15 = smov 0  }
   0x3 LB: > { %s428_s16 = sadd.s32 4294967295, %s567_s15   ;;  %s611_s17 = sadd.s32 1, %s567_s15   ;;  %s567_s15 = sphi %s597_s15, %s713_s15   ;;  %s563_s14 = sphi %s595_s14, %s712_s14   ;;  %s559_s13 = sphi %s593_s13, %s711_s13   ;;  %s555_s12 = sphi %s591_s12, %s710_s12  }
   0x4   : > { %s20_s18 = ssub.s32 %s567_s15, %s611_s17  ;;  %s23_s19 = sadd.s32 1, %s563_s14 }
   0x5   : > { %p21_p0 = scmp.eq.s32.totalorder %s20_s18, 0  ;;  %p30_p1 = scmp.ne.s32.totalorder %s563_s14, %s559_s13 }
   0x6   : > { %p31_p2 = scmp.eq.s32.totalorder %s567_s15, 0  ;;  %p36_p3 = scmp.ne.s32.totalorder %s559_s13, %s555_s12 }
   0x7   : > { %s621_s20 = scalar_select %p21_p0, %s563_s14, %s23_s19  }
   0x8   : > { %p623_p4 = por %p31_p2, %p30_p1  ;;  %p37_p5 = scmp.eq.s32.totalorder %s428_s16, 0 }
   0x9   : > { %p468_p6 = scmp.lt.s32.totalorder %s567_s15, 2  ;;  %s134_s23 = sand.u32 1, %s563_s14  }
   0xa   : > { %p630_p7 = por %p37_p5, %p36_p3  ;;  %s432_s24 = sshll.u32 %s134_s23, 6 }
   0xb   : > { %s455_s25 = sshll.u32 %s567_s15, 6  ;;  %s138_s29 = scalar_lea.vmem [#allocation2], %s432_s24 }
   0xc   : > { %s144_s28 = scalar_lea.hbm %s703_s0, %s455_s25  ;;  %s147_s30 = sshll.u32 %s138_s29, 4  ;;  %s148_s30 = int_to_ptr.vmem [resolvable:$true] %s147_s30 }
   0xd   : > { %s145_s4 = sshll.u32 %s144_s28, 4  ;;  %p641_p8 = pnand %p468_p6, %p623_p4  ;;  %s146_s4 = int_to_ptr.hbm [resolvable:$true] %s145_s4 }
   0xe   : > { %p436_p9 = scmp.ge.s32.totalorder %s567_s15, 1  ;;  %s135_s6 = scalar_lea.sflag [#allocation3], %s134_s23 }
   0xf   : > { %s503_s7 = sshra.s32 %s146_s4, 4  ;;  %p507_p11 = pneg %p641_p8  ;;  %s504_s7 = int_to_ptr.hbm [resolvable:$true] %s503_s7 }
  0x10   : > { %s505_s8 = scalar_lea.hbm %s504_s7, 64  ;;  %s510_s11 = scalar_lea.hbm %s703_s0, 128 }
  0x11   : > { %p506_p10 = scmp.ne.s32.totalorder %s504_s7, %s505_s8  ;;  %p511_p0 = scmp.lt.s32.totalorder %s504_s7, %s703_s0 }
  0x12   : > { %p512_p1 = scmp.lt.s32.totalorder %s510_s11, %s505_s8 }
  0x13   : > { %p508_p12 = pnand %p507_p11, %p506_p10 }
  0x14   : > { %p513_p2 = por %p512_p1, %p511_p0 }
  0x15   : > { %p509_p13 = pneg %p508_p12 }
  0x17   : > { %p514_p3 = pnand %p513_p2, %p509_p13 }
  0x19   : > { %517 = shalt.err (!%p514_p3)
}
  0x1a   : > { %s569_s19 = smov 128   ;;  %s570_s21 = smov 8  }
  0x1b   : > { %467 = dma.hbm_to_vmem [thread:$0]  (!%p641_p8), %s146_s4, 1024, %s148_s30, %s135_s6, %s569_s19, %s569_s19, %s570_s21  }
  0x1c   : > { %p155_p4 = scmp.lt.s32.totalorder %s567_s15, 3 }
  0x1e   : > { %p156_p5 = pnand %p436_p9, %p155_p4 }
  0x1f   : > { %s161_s23 = sand.u32 (!%p156_p5), 1, %s559_s13  }
  0x20   : > { %159 = sbr.rel (%p156_p5) target bundleno = 319 (0x13f), region = 32  ;;  %s437_s24 = sshll.u32 (!%p156_p5), %s161_s23, 6 }
  0x21   : > { %s162_s25 = scalar_lea.sflag (!%p156_p5), [#allocation3], %s161_s23  ;;  %s165_s26 = scalar_lea.vmem (!%p156_p5), [#allocation2], %s437_s24 }
  0x25   : > { %550 = dma.done.wait (%p630_p7), %s162_s25, 1024  }
  0x26   : > { %552 = vsyncadd (%p630_p7), %s162_s25, 4294966272  ;;  %v206_v0 = vld [vmem:[%s705_s2 + $0x8] sm:$0xff]  ;;  %v205_v1 = vld [vmem:[%s705_s2] sm:$0xff]  ;;  %vm207_vm0 = vcmask 130048   ;;  %s438_s5 = sshll.u32 %s428_s16, 2  ;;  %vm356_vm1 = vcmask 27648  }
  0x27   : > { %246 = vmatpush.msra.mxu0 %v206_v0  ;;  %457 = vmatpush.msra.mxu2 %v206_v0  ;;  %v196_v2 = vld [vmem:[%s165_s26] sm:$0xff]  ;;  %v202_v4 = vld [vmem:[%s165_s26 + $0x30] sm:$0xff]  ;;  %v199_v5 = vld [vmem:[%s165_s26 + $0x18] sm:$0xff]  ;;  %p191_p6 = scmp.lt.s32.totalorder %s438_s5, 7 }
  0x28   : > { %v200_v3 = vld [vmem:[%s165_s26 + $0x20] sm:$0xff]  ;;  %458 = vmatpush.msra.mxu3 %v206_v0  ;;  %456 = vmatpush.msra.mxu1 %v206_v0  ;;  %v197_v6 = vld [vmem:[%s165_s26 + $0x8] sm:$0xff]  ;;  %v203_v8 = vld [vmem:[%s165_s26 + $0x38] sm:$0xff] }
  0x29   : > { %247 = vmatpush.msra.mxu0 %v205_v1  ;;  %460 = vmatpush.msra.mxu2 %v205_v1  ;;  %v201_v7 = vld [vmem:[%s165_s26 + $0x28] sm:$0xff]  ;;  %v198_v9 = vld [vmem:[%s165_s26 + $0x10] sm:$0xff]  ;;  %v204_v15 = vld [vmem:[%s704_s1] sm:$0xf]  ;;  %s715_s5 = smov (!%p191_p6, %s438_s5), 7 }
  0x2a   : > { %440 = vmatmul.msk.f32.vlgmr.msra.gmra.mxu0 %vm207_vm0, %v196_v2  ;;  %444 = vmatmul.msk.f32.vlgmr.msra.gmra.mxu2 %vm207_vm0, %v200_v3  ;;  %s439_s6 = sshll.u32 %s715_s5, 2 }
  0x2b   : > { %461 = vmatpush.msra.mxu3 %v205_v1  ;;  %459 = vmatpush.msra.mxu1 %v205_v1  ;;  %s194_s9 = scalar_lea.vmem %s706_s3, %s439_s6 }
  0x2c   : > { %446 = vmatmul.msk.f32.vlgmr.msra.gmra.mxu3 %vm207_vm0, %v202_v4  ;;  %443 = vmatmul.msk.f32.vlgmr.msra.gmra.mxu1 %vm207_vm0, %v199_v5 }
  0x32   : > { %441 = vmatmul.msk.f32.gmra.mxu0 %vm207_vm0, %v197_v6  ;;  %445 = vmatmul.msk.f32.gmra.mxu2 %vm207_vm0, %v201_v7 }
  0x34   : > { %447 = vmatmul.msk.f32.gmra.mxu3 %vm207_vm0, %v203_v8 }
  0x3a   : > { %442 = vmatmul.msk.f32.gmra.mxu0 %vm207_vm0, %v198_v9 }
  0xa7   : > { %v249_v10 = vpop.f32.mrf.mxu0 }
  0xa9   : > { %v258_v11 = vpop.f32.mrf.mxu1 }
  0xaa   : > { %310 = vmatpush.msrb.mxu2 %v258_v11 }
  0xad   : > { %v261_v12 = vpop.f32.mrf.mxu2 }
  0xaf   : > { %v252_v13 = vpop.f32.mrf.mxu0  ;;  %v267_v14 = vpop.f32.mrf.mxu3 }
  0xb0   : > { %290 = vmatpush.msrb.mxu1 %v252_v13 }
  0xb2   : > { %291 = vmatpush.msrb.mxu1 %v249_v10 }
  0xb3   : > { %448 = vmatmul.msk.f32.vlgmr.msrb.gmra.mxu1 %vm207_vm0, %v204_v15 }
  0xb5   : > { %v264_v16 = vpop.f32.mrf.mxu2 }
  0xb6   : > { %330 = vmatpush.msrb.mxu3 %v264_v16 }
  0xb7   : > { %v270_v17 = vpop.f32.mrf.mxu3  ;;  %v255_v18 = vpop.f32.mrf.mxu0 }
  0xb8   : > { %331 = vmatpush.msrb.mxu3 %v261_v12  ;;  %350 = vmatpush.msra.mxu1 %v270_v17 }
  0xb9   : > { %311 = vmatpush.msrb.mxu2 %v255_v18  ;;  %450 = vmatmul.msk.f32.vlgmr.msrb.gmra.mxu3 %vm207_vm0, %v204_v15 }
  0xba   : > { %351 = vmatpush.msra.mxu1 %v267_v14  ;;  %449 = vmatmul.msk.f32.vlgmr.msrb.gmra.mxu2 %vm207_vm0, %v204_v15 }
  0xbb   : > { %451 = vmatmul.msk.f32.vlgmr.msra.gmra.mxu1 %vm207_vm0, %v204_v15 }
 0x130   : > { %v293_v19 = vpop.f32.mrf.mxu1 }
 0x131   : > { %357 = vst.msk [vmem:[%s194_s9] sm:$0xf] %vm356_vm1, %v293_v19 }
 0x138   : > { %v353_v22 = vpop.f32.mrf.mxu1 }
 0x139   : > { %360 = vst.msk [vmem:[%s194_s9 + $0xc] sm:$0xf] %vm356_vm1, %v353_v22 }
 0x13c   : > { %v333_v20 = vpop.f32.mrf.mxu3 }
 0x13d   : > { %v313_v21 = vpop.f32.mrf.mxu2  ;;  %359 = vst.msk [vmem:[%s194_s9 + $0x8] sm:$0xf] %vm356_vm1, %v333_v20 }
 0x13e   : > { %358 = vst.msk [vmem:[%s194_s9 + $0x4] sm:$0xf] %vm356_vm1, %v313_v21 }
 0x13f PF: > { %p13_p7 = scmp.ge.s32.totalorder %s611_s17, 4   ;;  %s710_s12 = smov %s559_s13 }
 0x140   : > { %s711_s13 = smov %s563_s14  ;;  %s712_s14 = smov %s621_s20 }
 0x141   : > { %s713_s15 = smov %s611_s17  ;;  %15 = sbr.rel (!%p13_p7) target bundleno = 3 (0x3), region = 72 }
 0x146   :  { %383 = vsyncpa [#allocation3], 1 }
 0x147   :  { %385 = vsyncpa [#allocation3 + $0x1], 1 }

</bundles_post_ra>
